<compile_context>
chip_gen: v7x
topology: tpu7x:2x2x1
jax: 0.10.0
libtpu: 0.0.40
codegen_flags: <defaults>
</compile_context>

<pallas_src>
import jax
import jax.numpy as jnp
from jax.experimental import pallas as pl
from jax.experimental.pallas import tpu as pltpu


def _upsample2x_kernel(x_ref, o_ref):
    # x_ref: (TH, W, sub, lane)          input rows
    # o_ref: (TH, 2, W, 2, sub, lane)    2x2-replicated output rows
    x = x_ref[...]
    # Nearest-neighbour, scale_factor=2: copy each input element to its 2x2
    # output positions.  The replicated axes are leading (non-tiled) dims, so
    # these are plain strided-address stores: no XLU/MXU work, native dtype.
    for r in range(2):
        for s in range(2):
            o_ref[:, r, :, s] = x


def upsample_nearest_2x(x, *, target_block_bytes=1 << 20):
    """x: (N, C, H, W) -> (N, C, 2H, 2W), nearest-neighbour upsample by 2."""
    N, C, H, W = x.shape
    elt = jnp.dtype(x.dtype).itemsize
    B = N * C

    # Minor-two layout: prefer a dense 128-wide lane dim when possible.
    if B % 128 == 0:
        sub, lane = B // 128, 128
    else:
        sub, lane = N, C
    xr = jnp.transpose(x, (2, 3, 0, 1)).reshape(H, W, sub, lane)

    # Rows per grid step: large enough to amortize per-step overhead, small
    # enough that the double-buffered in+out footprint (~10x the input block)
    # fits comfortably in VMEM on v5e/v6e/v7x.
    row_bytes = W * B * elt
    TH = max(1, min(H, target_block_bytes // max(1, row_bytes)))
    if TH >= H and H > 1:
        TH = pl.cdiv(H, 2)  # keep >= 2 grid steps so v7x's two TCs both work
    grid = (pl.cdiv(H, TH),)

    out6 = pl.pallas_call(
        _upsample2x_kernel,
        out_shape=jax.ShapeDtypeStruct((H, 2, W, 2, sub, lane), x.dtype),
        grid_spec=pltpu.PrefetchScalarGridSpec(
            num_scalar_prefetch=0,
            grid=grid,
            in_specs=[pl.BlockSpec((TH, W, sub, lane),
                                   lambda i: (i, 0, 0, 0))],
            out_specs=pl.BlockSpec((TH, 2, W, 2, sub, lane),
                                   lambda i: (i, 0, 0, 0, 0, 0)),
        ),
        compiler_params=pltpu.CompilerParams(
            dimension_semantics=("parallel",),
            vmem_limit_bytes=32 * 1024 * 1024,
        ),
        cost_estimate=pl.CostEstimate(
            flops=0,
            transcendentals=0,
            bytes_accessed=5 * B * H * W * elt,  # read X, write 4X
        ),
    )(xr)

    out = out6.reshape(2 * H, 2 * W, N, C)   # free: identical linear order
    return jnp.transpose(out, (2, 3, 0, 1))  # back to NCHW


def _reference(x):
    return jnp.repeat(jnp.repeat(x, 2, axis=2), 2, axis=3)


if __name__ == "__main__":
    key = jax.random.PRNGKey(0)
    x32 = jax.random.normal(key, (2, 4, 16, 16), dtype=jnp.float32)

    y32 = jax.block_until_ready(upsample_nearest_2x(x32))
    assert y32.shape == (2, 4, 32, 32), y32.shape
    assert y32.dtype == x32.dtype, y32.dtype
    assert bool(jnp.array_equal(y32, _reference(x32))), "f32 mismatch vs reference"

    # Native-dtype path (no float32 round trip): bf16 stays bit-exact.
    x16 = x32.astype(jnp.bfloat16)
    y16 = jax.block_until_ready(upsample_nearest_2x(x16))
    assert y16.dtype == jnp.bfloat16, y16.dtype
    assert bool(jnp.array_equal(y16, _reference(x16))), "bf16 mismatch vs reference"

    print("KERNEL_OK")
</pallas_src>

<mosaic_0001>
module attributes {stable_mosaic.version = 11 : i64} {
  func.func @_upsample2x_kernel(%arg0: i32, %arg1: memref<8x16x2x4xf32, #tpu.memory_space<vmem>>, %arg2: memref<8x2x16x2x2x4xf32, #tpu.memory_space<vmem>>) attributes {dimension_semantics = [#tpu.dimension_semantics<parallel>], iteration_bounds = array<i64: 2>, scalar_prefetch = 0 : i64, scratch_operands = 0 : i64, tpu.core_type = #tpu.core_type<tc>, window_params = [{transform_indices = @transform_0, window_bounds = array<i64: 8, 16, 2, 4>}, {transform_indices = @transform_1, window_bounds = array<i64: 8, 2, 16, 2, 2, 4>}]} {
    %c0 = arith.constant 0 : index
    %c0_0 = arith.constant 0 : index
    %c0_1 = arith.constant 0 : index
    %c0_2 = arith.constant 0 : index
    %0 = vector.load %arg1[%c0, %c0_0, %c0_1, %c0_2] : memref<8x16x2x4xf32, #tpu.memory_space<vmem>>, vector<8x16x2x4xf32>
    %c0_3 = arith.constant 0 : index
    %c0_4 = arith.constant 0 : index
    %c0_5 = arith.constant 0 : index
    %c0_6 = arith.constant 0 : index
    %c0_7 = arith.constant 0 : index
    %c0_8 = arith.constant 0 : index
    %1 = vector.load %arg2[%c0_3, %c0_4, %c0_5, %c0_6, %c0_7, %c0_8] : memref<8x2x16x2x2x4xf32, #tpu.memory_space<vmem>>, vector<8x1x16x1x2x4xf32>
    %2 = vector.shape_cast %1 : vector<8x1x16x1x2x4xf32> to vector<8x16x2x4xf32>
    %3 = vector.shape_cast %0 : vector<8x16x2x4xf32> to vector<8x1x16x1x2x4xf32>
    tpu.vector_store %arg2[%c0_3, %c0_4, %c0_5, %c0_6, %c0_7, %c0_8], %3 {strides = array<i32>} : memref<8x2x16x2x2x4xf32, #tpu.memory_space<vmem>>, vector<8x1x16x1x2x4xf32>,
    %c0_9 = arith.constant 0 : index
    %c0_10 = arith.constant 0 : index
    %c0_11 = arith.constant 0 : index
    %c1 = arith.constant 1 : index
    %c0_12 = arith.constant 0 : index
    %c0_13 = arith.constant 0 : index
    %4 = vector.load %arg2[%c0_9, %c0_10, %c0_11, %c1, %c0_12, %c0_13] : memref<8x2x16x2x2x4xf32, #tpu.memory_space<vmem>>, vector<8x1x16x1x2x4xf32>
    %5 = vector.shape_cast %4 : vector<8x1x16x1x2x4xf32> to vector<8x16x2x4xf32>
    %6 = vector.shape_cast %0 : vector<8x16x2x4xf32> to vector<8x1x16x1x2x4xf32>
    tpu.vector_store %arg2[%c0_9, %c0_10, %c0_11, %c1, %c0_12, %c0_13], %6 {strides = array<i32>} : memref<8x2x16x2x2x4xf32, #tpu.memory_space<vmem>>, vector<8x1x16x1x2x4xf32>,
    %c0_14 = arith.constant 0 : index
    %c1_15 = arith.constant 1 : index
    %c0_16 = arith.constant 0 : index
    %c0_17 = arith.constant 0 : index
    %c0_18 = arith.constant 0 : index
    %c0_19 = arith.constant 0 : index
    %7 = vector.load %arg2[%c0_14, %c1_15, %c0_16, %c0_17, %c0_18, %c0_19] : memref<8x2x16x2x2x4xf32, #tpu.memory_space<vmem>>, vector<8x1x16x1x2x4xf32>
    %8 = vector.shape_cast %7 : vector<8x1x16x1x2x4xf32> to vector<8x16x2x4xf32>
    %9 = vector.shape_cast %0 : vector<8x16x2x4xf32> to vector<8x1x16x1x2x4xf32>
    tpu.vector_store %arg2[%c0_14, %c1_15, %c0_16, %c0_17, %c0_18, %c0_19], %9 {strides = array<i32>} : memref<8x2x16x2x2x4xf32, #tpu.memory_space<vmem>>, vector<8x1x16x1x2x4xf32>,
    %c0_20 = arith.constant 0 : index
    %c1_21 = arith.constant 1 : index
    %c0_22 = arith.constant 0 : index
    %c1_23 = arith.constant 1 : index
    %c0_24 = arith.constant 0 : index
    %c0_25 = arith.constant 0 : index
    %10 = vector.load %arg2[%c0_20, %c1_21, %c0_22, %c1_23, %c0_24, %c0_25] : memref<8x2x16x2x2x4xf32, #tpu.memory_space<vmem>>, vector<8x1x16x1x2x4xf32>
    %11 = vector.shape_cast %10 : vector<8x1x16x1x2x4xf32> to vector<8x16x2x4xf32>
    %12 = vector.shape_cast %0 : vector<8x16x2x4xf32> to vector<8x1x16x1x2x4xf32>
    tpu.vector_store %arg2[%c0_20, %c1_21, %c0_22, %c1_23, %c0_24, %c0_25], %12 {strides = array<i32>} : memref<8x2x16x2x2x4xf32, #tpu.memory_space<vmem>>, vector<8x1x16x1x2x4xf32>,
    return
  }
  func.func @transform_0(%arg0: i32) -> (i32, i32, i32, i32) {
    %c0_i32 = arith.constant 0 : i32
    %c0_i32_0 = arith.constant 0 : i32
    %c0_i32_1 = arith.constant 0 : i32
    %c0_i32_2 = arith.constant 0 : i32
    return %arg0, %c0_i32, %c0_i32_0, %c0_i32_1 : i32, i32, i32, i32
  }
  func.func @transform_1(%arg0: i32) -> (i32, i32, i32, i32, i32, i32) {
    %c0_i32 = arith.constant 0 : i32
    %c0_i32_0 = arith.constant 0 : i32
    %c0_i32_1 = arith.constant 0 : i32
    %c0_i32_2 = arith.constant 0 : i32
    %c0_i32_3 = arith.constant 0 : i32
    %c0_i32_4 = arith.constant 0 : i32
    return %arg0, %c0_i32, %c0_i32_0, %c0_i32_1, %c0_i32_2, %c0_i32_3 : i32, i32, i32, i32, i32, i32
  }
}

</mosaic_0001>

<bundles_post_ra>
// kernel: tpu_custom_call.1
= control target key start
LH: loop header
LB: loop body
LE: loop exit
PB: predicated region body
PF: predicated region fallthrough
CT: control target
= control target key end

     0   :  { %s1252_s6 = smov 0   ;;  %s2425_s0 = inlined_call_operand.vmem [shape: f32[16,16,2,4], index: 0, kind: input, shape index: {}]   ;;  %s2426_s1 = inlined_call_operand.vmem [shape: f32[16,2,16,2,2,4], index: 1, kind: output, shape index: {}]  }
   0x1 LB: > { %s827_s7 = sadd.s32 4294967295, %s1240_s6   ;;  %p831_p0 = scmp.ge.s32.totalorder %s1240_s6, 1  ;;  %s1240_s6 = sphi %s1252_s6, %s11_s6  }
   0x2   : > { %p89_p1 = scmp.lt.s32.totalorder %s1240_s6, 3 }
   0x4   : > { %p90_p2 = pnand %p831_p0, %p89_p1 }
   0x5   : > { %s832_s8 = sshll.u32 (!%p90_p2), %s827_s7, 3  ;;  %vm253_vm0 = vcmask (!%p90_p2), 25600  }
   0x6   : > { %93 = sbr.rel (%p90_p2) target bundleno = 273 (0x111), region = 24  ;;  %p112_p3 = scmp.lt.s32.totalorder (!%p90_p2), %s832_s8, 15 }
   0xd   : > { %s2428_s8 = smov (!%p112_p3, %s832_s8), 15 }
   0xe   : > { %s1224_s9 = sshll.u32 %s2428_s8, 5  ;;  %s1225_s10 = sshll.u32 %s2428_s8, 7 }
   0xf   : > { %s1263_s13 = scalar_lea.vmem %s2425_s0, %s1224_s9  ;;  %s1268_s16 = scalar_lea.vmem %s2426_s1, %s1225_s10 }
  0x10   : > { %v125_v0 = vld [vmem:[%s1263_s13] sm:$0x3]  ;;  %v126_v1 = vld [vmem:[%s1263_s13 + $0x2] sm:$0x3]  ;;  %v127_v2 = vld [vmem:[%s1263_s13 + $0x4] sm:$0x3] }
  0x11   : > { %254 = vst.msk [vmem:[%s1268_s16] sm:$0x3] %vm253_vm0, %v125_v0  ;;  %838 = vst.msk [vmem:[%s1268_s16 + $0x2] sm:$0x3] %vm253_vm0, %v125_v0  ;;  %v128_v3 = vld [vmem:[%s1263_s13 + $0x6] sm:$0x3] }
  0x12   : > { %966 = vst.msk [vmem:[%s1268_s16 + $0x40] sm:$0x3] %vm253_vm0, %v125_v0  ;;  %1094 = vst.msk [vmem:[%s1268_s16 + $0x42] sm:$0x3] %vm253_vm0, %v125_v0  ;;  %v129_v4 = vld [vmem:[%s1263_s13 + $0x8] sm:$0x3] }
  0x13   : > { %255 = vst.msk [vmem:[%s1268_s16 + $0x4] sm:$0x3] %vm253_vm0, %v126_v1  ;;  %839 = vst.msk [vmem:[%s1268_s16 + $0x6] sm:$0x3] %vm253_vm0, %v126_v1  ;;  %v130_v5 = vld [vmem:[%s1263_s13 + $0xa] sm:$0x3] }
  0x14   : > { %967 = vst.msk [vmem:[%s1268_s16 + $0x44] sm:$0x3] %vm253_vm0, %v126_v1  ;;  %1095 = vst.msk [vmem:[%s1268_s16 + $0x46] sm:$0x3] %vm253_vm0, %v126_v1  ;;  %v131_v6 = vld [vmem:[%s1263_s13 + $0xc] sm:$0x3] }
  0x15   : > { %256 = vst.msk [vmem:[%s1268_s16 + $0x8] sm:$0x3] %vm253_vm0, %v127_v2  ;;  %840 = vst.msk [vmem:[%s1268_s16 + $0xa] sm:$0x3] %vm253_vm0, %v127_v2  ;;  %v132_v7 = vld [vmem:[%s1263_s13 + $0xe] sm:$0x3] }
  0x16   : > { %968 = vst.msk [vmem:[%s1268_s16 + $0x48] sm:$0x3] %vm253_vm0, %v127_v2  ;;  %1096 = vst.msk [vmem:[%s1268_s16 + $0x4a] sm:$0x3] %vm253_vm0, %v127_v2  ;;  %v133_v8 = vld [vmem:[%s1263_s13 + $0x10] sm:$0x3] }
  0x17   : > { %257 = vst.msk [vmem:[%s1268_s16 + $0xc] sm:$0x3] %vm253_vm0, %v128_v3  ;;  %841 = vst.msk [vmem:[%s1268_s16 + $0xe] sm:$0x3] %vm253_vm0, %v128_v3  ;;  %v134_v9 = vld [vmem:[%s1263_s13 + $0x12] sm:$0x3] }
  0x18   : > { %969 = vst.msk [vmem:[%s1268_s16 + $0x4c] sm:$0x3] %vm253_vm0, %v128_v3  ;;  %1097 = vst.msk [vmem:[%s1268_s16 + $0x4e] sm:$0x3] %vm253_vm0, %v128_v3  ;;  %v135_v10 = vld [vmem:[%s1263_s13 + $0x14] sm:$0x3] }
  0x19   : > { %258 = vst.msk [vmem:[%s1268_s16 + $0x10] sm:$0x3] %vm253_vm0, %v129_v4  ;;  %842 = vst.msk [vmem:[%s1268_s16 + $0x12] sm:$0x3] %vm253_vm0, %v129_v4  ;;  %v136_v11 = vld [vmem:[%s1263_s13 + $0x16] sm:$0x3] }
  0x1a   : > { %970 = vst.msk [vmem:[%s1268_s16 + $0x50] sm:$0x3] %vm253_vm0, %v129_v4  ;;  %1098 = vst.msk [vmem:[%s1268_s16 + $0x52] sm:$0x3] %vm253_vm0, %v129_v4  ;;  %v137_v12 = vld [vmem:[%s1263_s13 + $0x18] sm:$0x3] }
  0x1b   : > { %259 = vst.msk [vmem:[%s1268_s16 + $0x14] sm:$0x3] %vm253_vm0, %v130_v5  ;;  %843 = vst.msk [vmem:[%s1268_s16 + $0x16] sm:$0x3] %vm253_vm0, %v130_v5  ;;  %v138_v13 = vld [vmem:[%s1263_s13 + $0x1a] sm:$0x3] }
  0x1c   : > { %971 = vst.msk [vmem:[%s1268_s16 + $0x54] sm:$0x3] %vm253_vm0, %v130_v5  ;;  %1099 = vst.msk [vmem:[%s1268_s16 + $0x56] sm:$0x3] %vm253_vm0, %v130_v5  ;;  %v139_v14 = vld [vmem:[%s1263_s13 + $0x1c] sm:$0x3] }
  0x1d   : > { %260 = vst.msk [vmem:[%s1268_s16 + $0x18] sm:$0x3] %vm253_vm0, %v131_v6  ;;  %844 = vst.msk [vmem:[%s1268_s16 + $0x1a] sm:$0x3] %vm253_vm0, %v131_v6  ;;  %v140_v15 = vld [vmem:[%s1263_s13 + $0x1e] sm:$0x3] }
  0x1e   : > { %972 = vst.msk [vmem:[%s1268_s16 + $0x58] sm:$0x3] %vm253_vm0, %v131_v6  ;;  %1100 = vst.msk [vmem:[%s1268_s16 + $0x5a] sm:$0x3] %vm253_vm0, %v131_v6  ;;  %v141_v16 = vld [vmem:[%s1263_s13 + $0x20] sm:$0x3] }
  0x1f   : > { %261 = vst.msk [vmem:[%s1268_s16 + $0x1c] sm:$0x3] %vm253_vm0, %v132_v7  ;;  %845 = vst.msk [vmem:[%s1268_s16 + $0x1e] sm:$0x3] %vm253_vm0, %v132_v7  ;;  %v142_v17 = vld [vmem:[%s1263_s13 + $0x22] sm:$0x3] }
  0x20   : > { %973 = vst.msk [vmem:[%s1268_s16 + $0x5c] sm:$0x3] %vm253_vm0, %v132_v7  ;;  %1101 = vst.msk [vmem:[%s1268_s16 + $0x5e] sm:$0x3] %vm253_vm0, %v132_v7  ;;  %v143_v18 = vld [vmem:[%s1263_s13 + $0x24] sm:$0x3] }
  0x21   : > { %262 = vst.msk [vmem:[%s1268_s16 + $0x20] sm:$0x3] %vm253_vm0, %v133_v8  ;;  %846 = vst.msk [vmem:[%s1268_s16 + $0x22] sm:$0x3] %vm253_vm0, %v133_v8  ;;  %v144_v19 = vld [vmem:[%s1263_s13 + $0x26] sm:$0x3] }
  0x22   : > { %974 = vst.msk [vmem:[%s1268_s16 + $0x60] sm:$0x3] %vm253_vm0, %v133_v8  ;;  %1102 = vst.msk [vmem:[%s1268_s16 + $0x62] sm:$0x3] %vm253_vm0, %v133_v8  ;;  %v145_v20 = vld [vmem:[%s1263_s13 + $0x28] sm:$0x3] }
  0x23   : > { %263 = vst.msk [vmem:[%s1268_s16 + $0x24] sm:$0x3] %vm253_vm0, %v134_v9  ;;  %847 = vst.msk [vmem:[%s1268_s16 + $0x26] sm:$0x3] %vm253_vm0, %v134_v9  ;;  %v146_v21 = vld [vmem:[%s1263_s13 + $0x2a] sm:$0x3] }
  0x24   : > { %975 = vst.msk [vmem:[%s1268_s16 + $0x64] sm:$0x3] %vm253_vm0, %v134_v9  ;;  %1103 = vst.msk [vmem:[%s1268_s16 + $0x66] sm:$0x3] %vm253_vm0, %v134_v9  ;;  %v147_v22 = vld [vmem:[%s1263_s13 + $0x2c] sm:$0x3] }
  0x25   : > { %264 = vst.msk [vmem:[%s1268_s16 + $0x28] sm:$0x3] %vm253_vm0, %v135_v10  ;;  %848 = vst.msk [vmem:[%s1268_s16 + $0x2a] sm:$0x3] %vm253_vm0, %v135_v10  ;;  %v148_v23 = vld [vmem:[%s1263_s13 + $0x2e] sm:$0x3] }
  0x26   : > { %976 = vst.msk [vmem:[%s1268_s16 + $0x68] sm:$0x3] %vm253_vm0, %v135_v10  ;;  %1104 = vst.msk [vmem:[%s1268_s16 + $0x6a] sm:$0x3] %vm253_vm0, %v135_v10  ;;  %v149_v24 = vld [vmem:[%s1263_s13 + $0x30] sm:$0x3] }
  0x27   : > { %265 = vst.msk [vmem:[%s1268_s16 + $0x2c] sm:$0x3] %vm253_vm0, %v136_v11  ;;  %849 = vst.msk [vmem:[%s1268_s16 + $0x2e] sm:$0x3] %vm253_vm0, %v136_v11  ;;  %v150_v25 = vld [vmem:[%s1263_s13 + $0x32] sm:$0x3] }
  0x28   : > { %977 = vst.msk [vmem:[%s1268_s16 + $0x6c] sm:$0x3] %vm253_vm0, %v136_v11  ;;  %1105 = vst.msk [vmem:[%s1268_s16 + $0x6e] sm:$0x3] %vm253_vm0, %v136_v11  ;;  %v151_v26 = vld [vmem:[%s1263_s13 + $0x34] sm:$0x3] }
  0x29   : > { %266 = vst.msk [vmem:[%s1268_s16 + $0x30] sm:$0x3] %vm253_vm0, %v137_v12  ;;  %850 = vst.msk [vmem:[%s1268_s16 + $0x32] sm:$0x3] %vm253_vm0, %v137_v12  ;;  %v152_v27 = vld [vmem:[%s1263_s13 + $0x36] sm:$0x3] }
  0x2a   : > { %978 = vst.msk [vmem:[%s1268_s16 + $0x70] sm:$0x3] %vm253_vm0, %v137_v12  ;;  %1106 = vst.msk [vmem:[%s1268_s16 + $0x72] sm:$0x3] %vm253_vm0, %v137_v12  ;;  %v153_v28 = vld [vmem:[%s1263_s13 + $0x38] sm:$0x3] }
  0x2b   : > { %267 = vst.msk [vmem:[%s1268_s16 + $0x34] sm:$0x3] %vm253_vm0, %v138_v13  ;;  %851 = vst.msk [vmem:[%s1268_s16 + $0x36] sm:$0x3] %vm253_vm0, %v138_v13  ;;  %v154_v29 = vld [vmem:[%s1263_s13 + $0x3a] sm:$0x3] }
  0x2c   : > { %979 = vst.msk [vmem:[%s1268_s16 + $0x74] sm:$0x3] %vm253_vm0, %v138_v13  ;;  %1107 = vst.msk [vmem:[%s1268_s16 + $0x76] sm:$0x3] %vm253_vm0, %v138_v13  ;;  %v155_v30 = vld [vmem:[%s1263_s13 + $0x3c] sm:$0x3] }
  0x2d   : > { %268 = vst.msk [vmem:[%s1268_s16 + $0x38] sm:$0x3] %vm253_vm0, %v139_v14  ;;  %852 = vst.msk [vmem:[%s1268_s16 + $0x3a] sm:$0x3] %vm253_vm0, %v139_v14  ;;  %v156_v31 = vld [vmem:[%s1263_s13 + $0x3e] sm:$0x3] }
  0x2e   : > { %980 = vst.msk [vmem:[%s1268_s16 + $0x78] sm:$0x3] %vm253_vm0, %v139_v14  ;;  %1108 = vst.msk [vmem:[%s1268_s16 + $0x7a] sm:$0x3] %vm253_vm0, %v139_v14  ;;  %v157_v32 = vld [vmem:[%s1263_s13 + $0x40] sm:$0x3] }
  0x2f   : > { %269 = vst.msk [vmem:[%s1268_s16 + $0x3c] sm:$0x3] %vm253_vm0, %v140_v15  ;;  %853 = vst.msk [vmem:[%s1268_s16 + $0x3e] sm:$0x3] %vm253_vm0, %v140_v15  ;;  %v158_v33 = vld [vmem:[%s1263_s13 + $0x42] sm:$0x3] }
  0x30   : > { %981 = vst.msk [vmem:[%s1268_s16 + $0x7c] sm:$0x3] %vm253_vm0, %v140_v15  ;;  %1109 = vst.msk [vmem:[%s1268_s16 + $0x7e] sm:$0x3] %vm253_vm0, %v140_v15  ;;  %v159_v34 = vld [vmem:[%s1263_s13 + $0x44] sm:$0x3] }
  0x31   : > { %270 = vst.msk [vmem:[%s1268_s16 + $0x80] sm:$0x3] %vm253_vm0, %v141_v16  ;;  %854 = vst.msk [vmem:[%s1268_s16 + $0x82] sm:$0x3] %vm253_vm0, %v141_v16  ;;  %v160_v35 = vld [vmem:[%s1263_s13 + $0x46] sm:$0x3] }
  0x32   : > { %982 = vst.msk [vmem:[%s1268_s16 + $0xc0] sm:$0x3] %vm253_vm0, %v141_v16  ;;  %1110 = vst.msk [vmem:[%s1268_s16 + $0xc2] sm:$0x3] %vm253_vm0, %v141_v16  ;;  %v161_v36 = vld [vmem:[%s1263_s13 + $0x48] sm:$0x3] }
  0x33   : > { %271 = vst.msk [vmem:[%s1268_s16 + $0x84] sm:$0x3] %vm253_vm0, %v142_v17  ;;  %855 = vst.msk [vmem:[%s1268_s16 + $0x86] sm:$0x3] %vm253_vm0, %v142_v17  ;;  %v162_v37 = vld [vmem:[%s1263_s13 + $0x4a] sm:$0x3] }
  0x34   : > { %983 = vst.msk [vmem:[%s1268_s16 + $0xc4] sm:$0x3] %vm253_vm0, %v142_v17  ;;  %1111 = vst.msk [vmem:[%s1268_s16 + $0xc6] sm:$0x3] %vm253_vm0, %v142_v17  ;;  %v163_v38 = vld [vmem:[%s1263_s13 + $0x4c] sm:$0x3] }
  0x35   : > { %272 = vst.msk [vmem:[%s1268_s16 + $0x88] sm:$0x3] %vm253_vm0, %v143_v18  ;;  %856 = vst.msk [vmem:[%s1268_s16 + $0x8a] sm:$0x3] %vm253_vm0, %v143_v18  ;;  %v164_v39 = vld [vmem:[%s1263_s13 + $0x4e] sm:$0x3] }
  0x36   : > { %984 = vst.msk [vmem:[%s1268_s16 + $0xc8] sm:$0x3] %vm253_vm0, %v143_v18  ;;  %1112 = vst.msk [vmem:[%s1268_s16 + $0xca] sm:$0x3] %vm253_vm0, %v143_v18  ;;  %v165_v40 = vld [vmem:[%s1263_s13 + $0x50] sm:$0x3] }
  0x37   : > { %273 = vst.msk [vmem:[%s1268_s16 + $0x8c] sm:$0x3] %vm253_vm0, %v144_v19  ;;  %857 = vst.msk [vmem:[%s1268_s16 + $0x8e] sm:$0x3] %vm253_vm0, %v144_v19  ;;  %v166_v41 = vld [vmem:[%s1263_s13 + $0x52] sm:$0x3] }
  0x38   : > { %985 = vst.msk [vmem:[%s1268_s16 + $0xcc] sm:$0x3] %vm253_vm0, %v144_v19  ;;  %1113 = vst.msk [vmem:[%s1268_s16 + $0xce] sm:$0x3] %vm253_vm0, %v144_v19  ;;  %v167_v42 = vld [vmem:[%s1263_s13 + $0x54] sm:$0x3] }
  0x39   : > { %274 = vst.msk [vmem:[%s1268_s16 + $0x90] sm:$0x3] %vm253_vm0, %v145_v20  ;;  %858 = vst.msk [vmem:[%s1268_s16 + $0x92] sm:$0x3] %vm253_vm0, %v145_v20  ;;  %v168_v43 = vld [vmem:[%s1263_s13 + $0x56] sm:$0x3] }
  0x3a   : > { %986 = vst.msk [vmem:[%s1268_s16 + $0xd0] sm:$0x3] %vm253_vm0, %v145_v20  ;;  %1114 = vst.msk [vmem:[%s1268_s16 + $0xd2] sm:$0x3] %vm253_vm0, %v145_v20  ;;  %v169_v44 = vld [vmem:[%s1263_s13 + $0x58] sm:$0x3] }
  0x3b   : > { %275 = vst.msk [vmem:[%s1268_s16 + $0x94] sm:$0x3] %vm253_vm0, %v146_v21  ;;  %859 = vst.msk [vmem:[%s1268_s16 + $0x96] sm:$0x3] %vm253_vm0, %v146_v21  ;;  %v170_v45 = vld [vmem:[%s1263_s13 + $0x5a] sm:$0x3] }
  0x3c   : > { %987 = vst.msk [vmem:[%s1268_s16 + $0xd4] sm:$0x3] %vm253_vm0, %v146_v21  ;;  %1115 = vst.msk [vmem:[%s1268_s16 + $0xd6] sm:$0x3] %vm253_vm0, %v146_v21  ;;  %v171_v46 = vld [vmem:[%s1263_s13 + $0x5c] sm:$0x3] }
  0x3d   : > { %276 = vst.msk [vmem:[%s1268_s16 + $0x98] sm:$0x3] %vm253_vm0, %v147_v22  ;;  %860 = vst.msk [vmem:[%s1268_s16 + $0x9a] sm:$0x3] %vm253_vm0, %v147_v22  ;;  %v172_v47 = vld [vmem:[%s1263_s13 + $0x5e] sm:$0x3] }
  0x3e   : > { %988 = vst.msk [vmem:[%s1268_s16 + $0xd8] sm:$0x3] %vm253_vm0, %v147_v22  ;;  %1116 = vst.msk [vmem:[%s1268_s16 + $0xda] sm:$0x3] %vm253_vm0, %v147_v22  ;;  %v173_v48 = vld [vmem:[%s1263_s13 + $0x60] sm:$0x3] }
  0x3f   : > { %277 = vst.msk [vmem:[%s1268_s16 + $0x9c] sm:$0x3] %vm253_vm0, %v148_v23  ;;  %861 = vst.msk [vmem:[%s1268_s16 + $0x9e] sm:$0x3] %vm253_vm0, %v148_v23  ;;  %v174_v49 = vld [vmem:[%s1263_s13 + $0x62] sm:$0x3] }
  0x40   : > { %989 = vst.msk [vmem:[%s1268_s16 + $0xdc] sm:$0x3] %vm253_vm0, %v148_v23  ;;  %1117 = vst.msk [vmem:[%s1268_s16 + $0xde] sm:$0x3] %vm253_vm0, %v148_v23  ;;  %v175_v50 = vld [vmem:[%s1263_s13 + $0x64] sm:$0x3] }
  0x41   : > { %278 = vst.msk [vmem:[%s1268_s16 + $0xa0] sm:$0x3] %vm253_vm0, %v149_v24  ;;  %862 = vst.msk [vmem:[%s1268_s16 + $0xa2] sm:$0x3] %vm253_vm0, %v149_v24  ;;  %v176_v51 = vld [vmem:[%s1263_s13 + $0x66] sm:$0x3] }
  0x42   : > { %990 = vst.msk [vmem:[%s1268_s16 + $0xe0] sm:$0x3] %vm253_vm0, %v149_v24  ;;  %1118 = vst.msk [vmem:[%s1268_s16 + $0xe2] sm:$0x3] %vm253_vm0, %v149_v24  ;;  %v177_v52 = vld [vmem:[%s1263_s13 + $0x68] sm:$0x3] }
  0x43   : > { %279 = vst.msk [vmem:[%s1268_s16 + $0xa4] sm:$0x3] %vm253_vm0, %v150_v25  ;;  %863 = vst.msk [vmem:[%s1268_s16 + $0xa6] sm:$0x3] %vm253_vm0, %v150_v25  ;;  %v178_v53 = vld [vmem:[%s1263_s13 + $0x6a] sm:$0x3] }
  0x44   : > { %991 = vst.msk [vmem:[%s1268_s16 + $0xe4] sm:$0x3] %vm253_vm0, %v150_v25  ;;  %1119 = vst.msk [vmem:[%s1268_s16 + $0xe6] sm:$0x3] %vm253_vm0, %v150_v25  ;;  %v179_v54 = vld [vmem:[%s1263_s13 + $0x6c] sm:$0x3] }
  0x45   : > { %280 = vst.msk [vmem:[%s1268_s16 + $0xa8] sm:$0x3] %vm253_vm0, %v151_v26  ;;  %864 = vst.msk [vmem:[%s1268_s16 + $0xaa] sm:$0x3] %vm253_vm0, %v151_v26  ;;  %v180_v55 = vld [vmem:[%s1263_s13 + $0x6e] sm:$0x3] }
  0x46   : > { %992 = vst.msk [vmem:[%s1268_s16 + $0xe8] sm:$0x3] %vm253_vm0, %v151_v26  ;;  %1120 = vst.msk [vmem:[%s1268_s16 + $0xea] sm:$0x3] %vm253_vm0, %v151_v26  ;;  %v181_v56 = vld [vmem:[%s1263_s13 + $0x70] sm:$0x3] }
  0x47   : > { %281 = vst.msk [vmem:[%s1268_s16 + $0xac] sm:$0x3] %vm253_vm0, %v152_v27  ;;  %865 = vst.msk [vmem:[%s1268_s16 + $0xae] sm:$0x3] %vm253_vm0, %v152_v27  ;;  %v182_v57 = vld [vmem:[%s1263_s13 + $0x72] sm:$0x3] }
  0x48   : > { %993 = vst.msk [vmem:[%s1268_s16 + $0xec] sm:$0x3] %vm253_vm0, %v152_v27  ;;  %1121 = vst.msk [vmem:[%s1268_s16 + $0xee] sm:$0x3] %vm253_vm0, %v152_v27  ;;  %v183_v58 = vld [vmem:[%s1263_s13 + $0x74] sm:$0x3] }
  0x49   : > { %282 = vst.msk [vmem:[%s1268_s16 + $0xb0] sm:$0x3] %vm253_vm0, %v153_v28  ;;  %866 = vst.msk [vmem:[%s1268_s16 + $0xb2] sm:$0x3] %vm253_vm0, %v153_v28  ;;  %v184_v59 = vld [vmem:[%s1263_s13 + $0x76] sm:$0x3] }
  0x4a   : > { %994 = vst.msk [vmem:[%s1268_s16 + $0xf0] sm:$0x3] %vm253_vm0, %v153_v28  ;;  %1122 = vst.msk [vmem:[%s1268_s16 + $0xf2] sm:$0x3] %vm253_vm0, %v153_v28  ;;  %v185_v60 = vld [vmem:[%s1263_s13 + $0x78] sm:$0x3] }
  0x4b   : > { %283 = vst.msk [vmem:[%s1268_s16 + $0xb4] sm:$0x3] %vm253_vm0, %v154_v29  ;;  %867 = vst.msk [vmem:[%s1268_s16 + $0xb6] sm:$0x3] %vm253_vm0, %v154_v29  ;;  %v186_v61 = vld [vmem:[%s1263_s13 + $0x7a] sm:$0x3] }
  0x4c   : > { %995 = vst.msk [vmem:[%s1268_s16 + $0xf4] sm:$0x3] %vm253_vm0, %v154_v29  ;;  %1123 = vst.msk [vmem:[%s1268_s16 + $0xf6] sm:$0x3] %vm253_vm0, %v154_v29  ;;  %v187_v62 = vld [vmem:[%s1263_s13 + $0x7c] sm:$0x3] }
  0x4d   : > { %284 = vst.msk [vmem:[%s1268_s16 + $0xb8] sm:$0x3] %vm253_vm0, %v155_v30  ;;  %868 = vst.msk [vmem:[%s1268_s16 + $0xba] sm:$0x3] %vm253_vm0, %v155_v30  ;;  %v188_v63 = vld [vmem:[%s1263_s13 + $0x7e] sm:$0x3] }
  0x4e   : > { %996 = vst.msk [vmem:[%s1268_s16 + $0xf8] sm:$0x3] %vm253_vm0, %v155_v30  ;;  %1124 = vst.msk [vmem:[%s1268_s16 + $0xfa] sm:$0x3] %vm253_vm0, %v155_v30  ;;  %v189_v0 = vld [vmem:[%s1263_s13 + $0x80] sm:$0x3] }
  0x4f   : > { %285 = vst.msk [vmem:[%s1268_s16 + $0xbc] sm:$0x3] %vm253_vm0, %v156_v31  ;;  %869 = vst.msk [vmem:[%s1268_s16 + $0xbe] sm:$0x3] %vm253_vm0, %v156_v31  ;;  %v190_v1 = vld [vmem:[%s1263_s13 + $0x82] sm:$0x3] }
  0x50   : > { %997 = vst.msk [vmem:[%s1268_s16 + $0xfc] sm:$0x3] %vm253_vm0, %v156_v31  ;;  %1125 = vst.msk [vmem:[%s1268_s16 + $0xfe] sm:$0x3] %vm253_vm0, %v156_v31  ;;  %v191_v2 = vld [vmem:[%s1263_s13 + $0x84] sm:$0x3] }
  0x51   : > { %286 = vst.msk [vmem:[%s1268_s16 + $0x100] sm:$0x3] %vm253_vm0, %v157_v32  ;;  %870 = vst.msk [vmem:[%s1268_s16 + $0x102] sm:$0x3] %vm253_vm0, %v157_v32  ;;  %v192_v3 = vld [vmem:[%s1263_s13 + $0x86] sm:$0x3] }
  0x52   : > { %998 = vst.msk [vmem:[%s1268_s16 + $0x140] sm:$0x3] %vm253_vm0, %v157_v32  ;;  %1126 = vst.msk [vmem:[%s1268_s16 + $0x142] sm:$0x3] %vm253_vm0, %v157_v32  ;;  %v193_v4 = vld [vmem:[%s1263_s13 + $0x88] sm:$0x3] }
  0x53   : > { %287 = vst.msk [vmem:[%s1268_s16 + $0x104] sm:$0x3] %vm253_vm0, %v158_v33  ;;  %871 = vst.msk [vmem:[%s1268_s16 + $0x106] sm:$0x3] %vm253_vm0, %v158_v33  ;;  %v194_v5 = vld [vmem:[%s1263_s13 + $0x8a] sm:$0x3] }
  0x54   : > { %999 = vst.msk [vmem:[%s1268_s16 + $0x144] sm:$0x3] %vm253_vm0, %v158_v33  ;;  %1127 = vst.msk [vmem:[%s1268_s16 + $0x146] sm:$0x3] %vm253_vm0, %v158_v33  ;;  %v195_v6 = vld [vmem:[%s1263_s13 + $0x8c] sm:$0x3] }
  0x55   : > { %288 = vst.msk [vmem:[%s1268_s16 + $0x108] sm:$0x3] %vm253_vm0, %v159_v34  ;;  %872 = vst.msk [vmem:[%s1268_s16 + $0x10a] sm:$0x3] %vm253_vm0, %v159_v34  ;;  %v196_v7 = vld [vmem:[%s1263_s13 + $0x8e] sm:$0x3] }
  0x56   : > { %1000 = vst.msk [vmem:[%s1268_s16 + $0x148] sm:$0x3] %vm253_vm0, %v159_v34  ;;  %1128 = vst.msk [vmem:[%s1268_s16 + $0x14a] sm:$0x3] %vm253_vm0, %v159_v34  ;;  %v197_v8 = vld [vmem:[%s1263_s13 + $0x90] sm:$0x3] }
  0x57   : > { %289 = vst.msk [vmem:[%s1268_s16 + $0x10c] sm:$0x3] %vm253_vm0, %v160_v35  ;;  %873 = vst.msk [vmem:[%s1268_s16 + $0x10e] sm:$0x3] %vm253_vm0, %v160_v35  ;;  %v198_v9 = vld [vmem:[%s1263_s13 + $0x92] sm:$0x3] }
  0x58   : > { %1001 = vst.msk [vmem:[%s1268_s16 + $0x14c] sm:$0x3] %vm253_vm0, %v160_v35  ;;  %1129 = vst.msk [vmem:[%s1268_s16 + $0x14e] sm:$0x3] %vm253_vm0, %v160_v35  ;;  %v199_v10 = vld [vmem:[%s1263_s13 + $0x94] sm:$0x3] }
  0x59   : > { %290 = vst.msk [vmem:[%s1268_s16 + $0x110] sm:$0x3] %vm253_vm0, %v161_v36  ;;  %874 = vst.msk [vmem:[%s1268_s16 + $0x112] sm:$0x3] %vm253_vm0, %v161_v36  ;;  %v200_v11 = vld [vmem:[%s1263_s13 + $0x96] sm:$0x3] }
  0x5a   : > { %1002 = vst.msk [vmem:[%s1268_s16 + $0x150] sm:$0x3] %vm253_vm0, %v161_v36  ;;  %1130 = vst.msk [vmem:[%s1268_s16 + $0x152] sm:$0x3] %vm253_vm0, %v161_v36  ;;  %v201_v12 = vld [vmem:[%s1263_s13 + $0x98] sm:$0x3] }
  0x5b   : > { %291 = vst.msk [vmem:[%s1268_s16 + $0x114] sm:$0x3] %vm253_vm0, %v162_v37  ;;  %875 = vst.msk [vmem:[%s1268_s16 + $0x116] sm:$0x3] %vm253_vm0, %v162_v37  ;;  %v202_v13 = vld [vmem:[%s1263_s13 + $0x9a] sm:$0x3] }
  0x5c   : > { %1003 = vst.msk [vmem:[%s1268_s16 + $0x154] sm:$0x3] %vm253_vm0, %v162_v37  ;;  %1131 = vst.msk [vmem:[%s1268_s16 + $0x156] sm:$0x3] %vm253_vm0, %v162_v37  ;;  %v203_v14 = vld [vmem:[%s1263_s13 + $0x9c] sm:$0x3] }
  0x5d   : > { %292 = vst.msk [vmem:[%s1268_s16 + $0x118] sm:$0x3] %vm253_vm0, %v163_v38  ;;  %876 = vst.msk [vmem:[%s1268_s16 + $0x11a] sm:$0x3] %vm253_vm0, %v163_v38  ;;  %v204_v15 = vld [vmem:[%s1263_s13 + $0x9e] sm:$0x3] }
  0x5e   : > { %1004 = vst.msk [vmem:[%s1268_s16 + $0x158] sm:$0x3] %vm253_vm0, %v163_v38  ;;  %1132 = vst.msk [vmem:[%s1268_s16 + $0x15a] sm:$0x3] %vm253_vm0, %v163_v38  ;;  %v205_v16 = vld [vmem:[%s1263_s13 + $0xa0] sm:$0x3] }
  0x5f   : > { %293 = vst.msk [vmem:[%s1268_s16 + $0x11c] sm:$0x3] %vm253_vm0, %v164_v39  ;;  %877 = vst.msk [vmem:[%s1268_s16 + $0x11e] sm:$0x3] %vm253_vm0, %v164_v39  ;;  %v206_v17 = vld [vmem:[%s1263_s13 + $0xa2] sm:$0x3] }
  0x60   : > { %1005 = vst.msk [vmem:[%s1268_s16 + $0x15c] sm:$0x3] %vm253_vm0, %v164_v39  ;;  %1133 = vst.msk [vmem:[%s1268_s16 + $0x15e] sm:$0x3] %vm253_vm0, %v164_v39  ;;  %v207_v18 = vld [vmem:[%s1263_s13 + $0xa4] sm:$0x3] }
  0x61   : > { %294 = vst.msk [vmem:[%s1268_s16 + $0x120] sm:$0x3] %vm253_vm0, %v165_v40  ;;  %878 = vst.msk [vmem:[%s1268_s16 + $0x122] sm:$0x3] %vm253_vm0, %v165_v40  ;;  %v208_v19 = vld [vmem:[%s1263_s13 + $0xa6] sm:$0x3] }
  0x62   : > { %1006 = vst.msk [vmem:[%s1268_s16 + $0x160] sm:$0x3] %vm253_vm0, %v165_v40  ;;  %1134 = vst.msk [vmem:[%s1268_s16 + $0x162] sm:$0x3] %vm253_vm0, %v165_v40  ;;  %v209_v20 = vld [vmem:[%s1263_s13 + $0xa8] sm:$0x3] }
  0x63   : > { %295 = vst.msk [vmem:[%s1268_s16 + $0x124] sm:$0x3] %vm253_vm0, %v166_v41  ;;  %879 = vst.msk [vmem:[%s1268_s16 + $0x126] sm:$0x3] %vm253_vm0, %v166_v41  ;;  %v210_v21 = vld [vmem:[%s1263_s13 + $0xaa] sm:$0x3] }
  0x64   : > { %1007 = vst.msk [vmem:[%s1268_s16 + $0x164] sm:$0x3] %vm253_vm0, %v166_v41  ;;  %1135 = vst.msk [vmem:[%s1268_s16 + $0x166] sm:$0x3] %vm253_vm0, %v166_v41  ;;  %v211_v22 = vld [vmem:[%s1263_s13 + $0xac] sm:$0x3] }
  0x65   : > { %296 = vst.msk [vmem:[%s1268_s16 + $0x128] sm:$0x3] %vm253_vm0, %v167_v42  ;;  %880 = vst.msk [vmem:[%s1268_s16 + $0x12a] sm:$0x3] %vm253_vm0, %v167_v42  ;;  %v212_v23 = vld [vmem:[%s1263_s13 + $0xae] sm:$0x3] }
  0x66   : > { %1008 = vst.msk [vmem:[%s1268_s16 + $0x168] sm:$0x3] %vm253_vm0, %v167_v42  ;;  %1136 = vst.msk [vmem:[%s1268_s16 + $0x16a] sm:$0x3] %vm253_vm0, %v167_v42  ;;  %v213_v24 = vld [vmem:[%s1263_s13 + $0xb0] sm:$0x3] }
  0x67   : > { %297 = vst.msk [vmem:[%s1268_s16 + $0x12c] sm:$0x3] %vm253_vm0, %v168_v43  ;;  %881 = vst.msk [vmem:[%s1268_s16 + $0x12e] sm:$0x3] %vm253_vm0, %v168_v43  ;;  %v214_v25 = vld [vmem:[%s1263_s13 + $0xb2] sm:$0x3] }
  0x68   : > { %1009 = vst.msk [vmem:[%s1268_s16 + $0x16c] sm:$0x3] %vm253_vm0, %v168_v43  ;;  %1137 = vst.msk [vmem:[%s1268_s16 + $0x16e] sm:$0x3] %vm253_vm0, %v168_v43  ;;  %v215_v26 = vld [vmem:[%s1263_s13 + $0xb4] sm:$0x3] }
  0x69   : > { %298 = vst.msk [vmem:[%s1268_s16 + $0x130] sm:$0x3] %vm253_vm0, %v169_v44  ;;  %882 = vst.msk [vmem:[%s1268_s16 + $0x132] sm:$0x3] %vm253_vm0, %v169_v44  ;;  %v216_v27 = vld [vmem:[%s1263_s13 + $0xb6] sm:$0x3] }
  0x6a   : > { %1010 = vst.msk [vmem:[%s1268_s16 + $0x170] sm:$0x3] %vm253_vm0, %v169_v44  ;;  %1138 = vst.msk [vmem:[%s1268_s16 + $0x172] sm:$0x3] %vm253_vm0, %v169_v44  ;;  %v217_v28 = vld [vmem:[%s1263_s13 + $0xb8] sm:$0x3] }
  0x6b   : > { %299 = vst.msk [vmem:[%s1268_s16 + $0x134] sm:$0x3] %vm253_vm0, %v170_v45  ;;  %883 = vst.msk [vmem:[%s1268_s16 + $0x136] sm:$0x3] %vm253_vm0, %v170_v45  ;;  %v218_v29 = vld [vmem:[%s1263_s13 + $0xba] sm:$0x3] }
  0x6c   : > { %1011 = vst.msk [vmem:[%s1268_s16 + $0x174] sm:$0x3] %vm253_vm0, %v170_v45  ;;  %1139 = vst.msk [vmem:[%s1268_s16 + $0x176] sm:$0x3] %vm253_vm0, %v170_v45  ;;  %v219_v30 = vld [vmem:[%s1263_s13 + $0xbc] sm:$0x3] }
  0x6d   : > { %300 = vst.msk [vmem:[%s1268_s16 + $0x138] sm:$0x3] %vm253_vm0, %v171_v46  ;;  %884 = vst.msk [vmem:[%s1268_s16 + $0x13a] sm:$0x3] %vm253_vm0, %v171_v46  ;;  %v220_v31 = vld [vmem:[%s1263_s13 + $0xbe] sm:$0x3] }
  0x6e   : > { %1012 = vst.msk [vmem:[%s1268_s16 + $0x178] sm:$0x3] %vm253_vm0, %v171_v46  ;;  %1140 = vst.msk [vmem:[%s1268_s16 + $0x17a] sm:$0x3] %vm253_vm0, %v171_v46  ;;  %v221_v32 = vld [vmem:[%s1263_s13 + $0xc0] sm:$0x3] }
  0x6f   : > { %301 = vst.msk [vmem:[%s1268_s16 + $0x13c] sm:$0x3] %vm253_vm0, %v172_v47  ;;  %885 = vst.msk [vmem:[%s1268_s16 + $0x13e] sm:$0x3] %vm253_vm0, %v172_v47  ;;  %v222_v33 = vld [vmem:[%s1263_s13 + $0xc2] sm:$0x3] }
  0x70   : > { %1013 = vst.msk [vmem:[%s1268_s16 + $0x17c] sm:$0x3] %vm253_vm0, %v172_v47  ;;  %1141 = vst.msk [vmem:[%s1268_s16 + $0x17e] sm:$0x3] %vm253_vm0, %v172_v47  ;;  %v223_v34 = vld [vmem:[%s1263_s13 + $0xc4] sm:$0x3] }
  0x71   : > { %302 = vst.msk [vmem:[%s1268_s16 + $0x180] sm:$0x3] %vm253_vm0, %v173_v48  ;;  %886 = vst.msk [vmem:[%s1268_s16 + $0x182] sm:$0x3] %vm253_vm0, %v173_v48  ;;  %v224_v35 = vld [vmem:[%s1263_s13 + $0xc6] sm:$0x3] }
  0x72   : > { %1014 = vst.msk [vmem:[%s1268_s16 + $0x1c0] sm:$0x3] %vm253_vm0, %v173_v48  ;;  %1142 = vst.msk [vmem:[%s1268_s16 + $0x1c2] sm:$0x3] %vm253_vm0, %v173_v48  ;;  %v225_v36 = vld [vmem:[%s1263_s13 + $0xc8] sm:$0x3] }
  0x73   : > { %303 = vst.msk [vmem:[%s1268_s16 + $0x184] sm:$0x3] %vm253_vm0, %v174_v49  ;;  %887 = vst.msk [vmem:[%s1268_s16 + $0x186] sm:$0x3] %vm253_vm0, %v174_v49  ;;  %v226_v37 = vld [vmem:[%s1263_s13 + $0xca] sm:$0x3] }
  0x74   : > { %1015 = vst.msk [vmem:[%s1268_s16 + $0x1c4] sm:$0x3] %vm253_vm0, %v174_v49  ;;  %1143 = vst.msk [vmem:[%s1268_s16 + $0x1c6] sm:$0x3] %vm253_vm0, %v174_v49  ;;  %v227_v38 = vld [vmem:[%s1263_s13 + $0xcc] sm:$0x3] }
  0x75   : > { %304 = vst.msk [vmem:[%s1268_s16 + $0x188] sm:$0x3] %vm253_vm0, %v175_v50  ;;  %888 = vst.msk [vmem:[%s1268_s16 + $0x18a] sm:$0x3] %vm253_vm0, %v175_v50  ;;  %v228_v39 = vld [vmem:[%s1263_s13 + $0xce] sm:$0x3] }
  0x76   : > { %1016 = vst.msk [vmem:[%s1268_s16 + $0x1c8] sm:$0x3] %vm253_vm0, %v175_v50  ;;  %1144 = vst.msk [vmem:[%s1268_s16 + $0x1ca] sm:$0x3] %vm253_vm0, %v175_v50  ;;  %v229_v40 = vld [vmem:[%s1263_s13 + $0xd0] sm:$0x3] }
  0x77   : > { %305 = vst.msk [vmem:[%s1268_s16 + $0x18c] sm:$0x3] %vm253_vm0, %v176_v51  ;;  %889 = vst.msk [vmem:[%s1268_s16 + $0x18e] sm:$0x3] %vm253_vm0, %v176_v51  ;;  %v230_v41 = vld [vmem:[%s1263_s13 + $0xd2] sm:$0x3] }
  0x78   : > { %1017 = vst.msk [vmem:[%s1268_s16 + $0x1cc] sm:$0x3] %vm253_vm0, %v176_v51  ;;  %1145 = vst.msk [vmem:[%s1268_s16 + $0x1ce] sm:$0x3] %vm253_vm0, %v176_v51  ;;  %v231_v42 = vld [vmem:[%s1263_s13 + $0xd4] sm:$0x3] }
  0x79   : > { %306 = vst.msk [vmem:[%s1268_s16 + $0x190] sm:$0x3] %vm253_vm0, %v177_v52  ;;  %890 = vst.msk [vmem:[%s1268_s16 + $0x192] sm:$0x3] %vm253_vm0, %v177_v52  ;;  %v232_v43 = vld [vmem:[%s1263_s13 + $0xd6] sm:$0x3] }
  0x7a   : > { %1018 = vst.msk [vmem:[%s1268_s16 + $0x1d0] sm:$0x3] %vm253_vm0, %v177_v52  ;;  %1146 = vst.msk [vmem:[%s1268_s16 + $0x1d2] sm:$0x3] %vm253_vm0, %v177_v52  ;;  %v233_v44 = vld [vmem:[%s1263_s13 + $0xd8] sm:$0x3] }
  0x7b   : > { %307 = vst.msk [vmem:[%s1268_s16 + $0x194] sm:$0x3] %vm253_vm0, %v178_v53  ;;  %891 = vst.msk [vmem:[%s1268_s16 + $0x196] sm:$0x3] %vm253_vm0, %v178_v53  ;;  %v234_v45 = vld [vmem:[%s1263_s13 + $0xda] sm:$0x3] }
  0x7c   : > { %1019 = vst.msk [vmem:[%s1268_s16 + $0x1d4] sm:$0x3] %vm253_vm0, %v178_v53  ;;  %1147 = vst.msk [vmem:[%s1268_s16 + $0x1d6] sm:$0x3] %vm253_vm0, %v178_v53  ;;  %v235_v46 = vld [vmem:[%s1263_s13 + $0xdc] sm:$0x3] }
  0x7d   : > { %308 = vst.msk [vmem:[%s1268_s16 + $0x198] sm:$0x3] %vm253_vm0, %v179_v54  ;;  %892 = vst.msk [vmem:[%s1268_s16 + $0x19a] sm:$0x3] %vm253_vm0, %v179_v54  ;;  %v236_v47 = vld [vmem:[%s1263_s13 + $0xde] sm:$0x3] }
  0x7e   : > { %1020 = vst.msk [vmem:[%s1268_s16 + $0x1d8] sm:$0x3] %vm253_vm0, %v179_v54  ;;  %1148 = vst.msk [vmem:[%s1268_s16 + $0x1da] sm:$0x3] %vm253_vm0, %v179_v54  ;;  %v237_v48 = vld [vmem:[%s1263_s13 + $0xe0] sm:$0x3] }
  0x7f   : > { %309 = vst.msk [vmem:[%s1268_s16 + $0x19c] sm:$0x3] %vm253_vm0, %v180_v55  ;;  %893 = vst.msk [vmem:[%s1268_s16 + $0x19e] sm:$0x3] %vm253_vm0, %v180_v55  ;;  %v238_v49 = vld [vmem:[%s1263_s13 + $0xe2] sm:$0x3] }
  0x80   : > { %1021 = vst.msk [vmem:[%s1268_s16 + $0x1dc] sm:$0x3] %vm253_vm0, %v180_v55  ;;  %1149 = vst.msk [vmem:[%s1268_s16 + $0x1de] sm:$0x3] %vm253_vm0, %v180_v55  ;;  %v239_v50 = vld [vmem:[%s1263_s13 + $0xe4] sm:$0x3] }
  0x81   : > { %310 = vst.msk [vmem:[%s1268_s16 + $0x1a0] sm:$0x3] %vm253_vm0, %v181_v56  ;;  %894 = vst.msk [vmem:[%s1268_s16 + $0x1a2] sm:$0x3] %vm253_vm0, %v181_v56  ;;  %v240_v51 = vld [vmem:[%s1263_s13 + $0xe6] sm:$0x3] }
  0x82   : > { %1022 = vst.msk [vmem:[%s1268_s16 + $0x1e0] sm:$0x3] %vm253_vm0, %v181_v56  ;;  %1150 = vst.msk [vmem:[%s1268_s16 + $0x1e2] sm:$0x3] %vm253_vm0, %v181_v56  ;;  %v241_v52 = vld [vmem:[%s1263_s13 + $0xe8] sm:$0x3] }
  0x83   : > { %311 = vst.msk [vmem:[%s1268_s16 + $0x1a4] sm:$0x3] %vm253_vm0, %v182_v57  ;;  %895 = vst.msk [vmem:[%s1268_s16 + $0x1a6] sm:$0x3] %vm253_vm0, %v182_v57  ;;  %v242_v53 = vld [vmem:[%s1263_s13 + $0xea] sm:$0x3] }
  0x84   : > { %1023 = vst.msk [vmem:[%s1268_s16 + $0x1e4] sm:$0x3] %vm253_vm0, %v182_v57  ;;  %1151 = vst.msk [vmem:[%s1268_s16 + $0x1e6] sm:$0x3] %vm253_vm0, %v182_v57  ;;  %v243_v54 = vld [vmem:[%s1263_s13 + $0xec] sm:$0x3] }
  0x85   : > { %312 = vst.msk [vmem:[%s1268_s16 + $0x1a8] sm:$0x3] %vm253_vm0, %v183_v58  ;;  %896 = vst.msk [vmem:[%s1268_s16 + $0x1aa] sm:$0x3] %vm253_vm0, %v183_v58  ;;  %v244_v55 = vld [vmem:[%s1263_s13 + $0xee] sm:$0x3] }
  0x86   : > { %1024 = vst.msk [vmem:[%s1268_s16 + $0x1e8] sm:$0x3] %vm253_vm0, %v183_v58  ;;  %1152 = vst.msk [vmem:[%s1268_s16 + $0x1ea] sm:$0x3] %vm253_vm0, %v183_v58  ;;  %v245_v56 = vld [vmem:[%s1263_s13 + $0xf0] sm:$0x3] }
  0x87   : > { %313 = vst.msk [vmem:[%s1268_s16 + $0x1ac] sm:$0x3] %vm253_vm0, %v184_v59  ;;  %897 = vst.msk [vmem:[%s1268_s16 + $0x1ae] sm:$0x3] %vm253_vm0, %v184_v59  ;;  %v246_v57 = vld [vmem:[%s1263_s13 + $0xf2] sm:$0x3] }
  0x88   : > { %1025 = vst.msk [vmem:[%s1268_s16 + $0x1ec] sm:$0x3] %vm253_vm0, %v184_v59  ;;  %1153 = vst.msk [vmem:[%s1268_s16 + $0x1ee] sm:$0x3] %vm253_vm0, %v184_v59  ;;  %v247_v58 = vld [vmem:[%s1263_s13 + $0xf4] sm:$0x3] }
  0x89   : > { %314 = vst.msk [vmem:[%s1268_s16 + $0x1b0] sm:$0x3] %vm253_vm0, %v185_v60  ;;  %898 = vst.msk [vmem:[%s1268_s16 + $0x1b2] sm:$0x3] %vm253_vm0, %v185_v60  ;;  %v248_v59 = vld [vmem:[%s1263_s13 + $0xf6] sm:$0x3] }
  0x8a   : > { %1026 = vst.msk [vmem:[%s1268_s16 + $0x1f0] sm:$0x3] %vm253_vm0, %v185_v60  ;;  %1154 = vst.msk [vmem:[%s1268_s16 + $0x1f2] sm:$0x3] %vm253_vm0, %v185_v60  ;;  %v249_v60 = vld [vmem:[%s1263_s13 + $0xf8] sm:$0x3] }
  0x8b   : > { %315 = vst.msk [vmem:[%s1268_s16 + $0x1b4] sm:$0x3] %vm253_vm0, %v186_v61  ;;  %899 = vst.msk [vmem:[%s1268_s16 + $0x1b6] sm:$0x3] %vm253_vm0, %v186_v61 }
  0x8c   : > { %1027 = vst.msk [vmem:[%s1268_s16 + $0x1f4] sm:$0x3] %vm253_vm0, %v186_v61  ;;  %1155 = vst.msk [vmem:[%s1268_s16 + $0x1f6] sm:$0x3] %vm253_vm0, %v186_v61  ;;  %v250_v61 = vld [vmem:[%s1263_s13 + $0xfa] sm:$0x3] }
  0x8d   : > { %316 = vst.msk [vmem:[%s1268_s16 + $0x1b8] sm:$0x3] %vm253_vm0, %v187_v62  ;;  %900 = vst.msk [vmem:[%s1268_s16 + $0x1ba] sm:$0x3] %vm253_vm0, %v187_v62 }
  0x8e   : > { %1028 = vst.msk [vmem:[%s1268_s16 + $0x1f8] sm:$0x3] %vm253_vm0, %v187_v62  ;;  %1156 = vst.msk [vmem:[%s1268_s16 + $0x1fa] sm:$0x3] %vm253_vm0, %v187_v62  ;;  %v251_v62 = vld [vmem:[%s1263_s13 + $0xfc] sm:$0x3] }
  0x8f   : > { %317 = vst.msk [vmem:[%s1268_s16 + $0x1bc] sm:$0x3] %vm253_vm0, %v188_v63  ;;  %901 = vst.msk [vmem:[%s1268_s16 + $0x1be] sm:$0x3] %vm253_vm0, %v188_v63 }
  0x90   : > { %1029 = vst.msk [vmem:[%s1268_s16 + $0x1fc] sm:$0x3] %vm253_vm0, %v188_v63  ;;  %1157 = vst.msk [vmem:[%s1268_s16 + $0x1fe] sm:$0x3] %vm253_vm0, %v188_v63  ;;  %v252_v63 = vld [vmem:[%s1263_s13 + $0xfe] sm:$0x3] }
  0x91   : > { %318 = vst.msk [vmem:[%s1268_s16 + $0x200] sm:$0x3] %vm253_vm0, %v189_v0  ;;  %902 = vst.msk [vmem:[%s1268_s16 + $0x202] sm:$0x3] %vm253_vm0, %v189_v0 }
  0x92   : > { %1030 = vst.msk [vmem:[%s1268_s16 + $0x240] sm:$0x3] %vm253_vm0, %v189_v0  ;;  %1158 = vst.msk [vmem:[%s1268_s16 + $0x242] sm:$0x3] %vm253_vm0, %v189_v0 }
  0x93   : > { %319 = vst.msk [vmem:[%s1268_s16 + $0x204] sm:$0x3] %vm253_vm0, %v190_v1  ;;  %903 = vst.msk [vmem:[%s1268_s16 + $0x206] sm:$0x3] %vm253_vm0, %v190_v1 }
  0x94   : > { %1031 = vst.msk [vmem:[%s1268_s16 + $0x244] sm:$0x3] %vm253_vm0, %v190_v1  ;;  %1159 = vst.msk [vmem:[%s1268_s16 + $0x246] sm:$0x3] %vm253_vm0, %v190_v1 }
  0x95   : > { %320 = vst.msk [vmem:[%s1268_s16 + $0x208] sm:$0x3] %vm253_vm0, %v191_v2  ;;  %904 = vst.msk [vmem:[%s1268_s16 + $0x20a] sm:$0x3] %vm253_vm0, %v191_v2 }
  0x96   : > { %1032 = vst.msk [vmem:[%s1268_s16 + $0x248] sm:$0x3] %vm253_vm0, %v191_v2  ;;  %1160 = vst.msk [vmem:[%s1268_s16 + $0x24a] sm:$0x3] %vm253_vm0, %v191_v2 }
  0x97   : > { %321 = vst.msk [vmem:[%s1268_s16 + $0x20c] sm:$0x3] %vm253_vm0, %v192_v3  ;;  %905 = vst.msk [vmem:[%s1268_s16 + $0x20e] sm:$0x3] %vm253_vm0, %v192_v3 }
  0x98   : > { %1033 = vst.msk [vmem:[%s1268_s16 + $0x24c] sm:$0x3] %vm253_vm0, %v192_v3  ;;  %1161 = vst.msk [vmem:[%s1268_s16 + $0x24e] sm:$0x3] %vm253_vm0, %v192_v3 }
  0x99   : > { %322 = vst.msk [vmem:[%s1268_s16 + $0x210] sm:$0x3] %vm253_vm0, %v193_v4  ;;  %906 = vst.msk [vmem:[%s1268_s16 + $0x212] sm:$0x3] %vm253_vm0, %v193_v4 }
  0x9a   : > { %1034 = vst.msk [vmem:[%s1268_s16 + $0x250] sm:$0x3] %vm253_vm0, %v193_v4  ;;  %1162 = vst.msk [vmem:[%s1268_s16 + $0x252] sm:$0x3] %vm253_vm0, %v193_v4 }
  0x9b   : > { %323 = vst.msk [vmem:[%s1268_s16 + $0x214] sm:$0x3] %vm253_vm0, %v194_v5  ;;  %907 = vst.msk [vmem:[%s1268_s16 + $0x216] sm:$0x3] %vm253_vm0, %v194_v5 }
  0x9c   : > { %1035 = vst.msk [vmem:[%s1268_s16 + $0x254] sm:$0x3] %vm253_vm0, %v194_v5  ;;  %1163 = vst.msk [vmem:[%s1268_s16 + $0x256] sm:$0x3] %vm253_vm0, %v194_v5 }
  0x9d   : > { %324 = vst.msk [vmem:[%s1268_s16 + $0x218] sm:$0x3] %vm253_vm0, %v195_v6  ;;  %908 = vst.msk [vmem:[%s1268_s16 + $0x21a] sm:$0x3] %vm253_vm0, %v195_v6 }
  0x9e   : > { %1036 = vst.msk [vmem:[%s1268_s16 + $0x258] sm:$0x3] %vm253_vm0, %v195_v6  ;;  %1164 = vst.msk [vmem:[%s1268_s16 + $0x25a] sm:$0x3] %vm253_vm0, %v195_v6 }
  0x9f   : > { %325 = vst.msk [vmem:[%s1268_s16 + $0x21c] sm:$0x3] %vm253_vm0, %v196_v7  ;;  %909 = vst.msk [vmem:[%s1268_s16 + $0x21e] sm:$0x3] %vm253_vm0, %v196_v7 }
  0xa0   : > { %1037 = vst.msk [vmem:[%s1268_s16 + $0x25c] sm:$0x3] %vm253_vm0, %v196_v7  ;;  %1165 = vst.msk [vmem:[%s1268_s16 + $0x25e] sm:$0x3] %vm253_vm0, %v196_v7 }
  0xa1   : > { %326 = vst.msk [vmem:[%s1268_s16 + $0x220] sm:$0x3] %vm253_vm0, %v197_v8  ;;  %910 = vst.msk [vmem:[%s1268_s16 + $0x222] sm:$0x3] %vm253_vm0, %v197_v8 }
  0xa2   : > { %1038 = vst.msk [vmem:[%s1268_s16 + $0x260] sm:$0x3] %vm253_vm0, %v197_v8  ;;  %1166 = vst.msk [vmem:[%s1268_s16 + $0x262] sm:$0x3] %vm253_vm0, %v197_v8 }
  0xa3   : > { %327 = vst.msk [vmem:[%s1268_s16 + $0x224] sm:$0x3] %vm253_vm0, %v198_v9  ;;  %911 = vst.msk [vmem:[%s1268_s16 + $0x226] sm:$0x3] %vm253_vm0, %v198_v9 }
  0xa4   : > { %1039 = vst.msk [vmem:[%s1268_s16 + $0x264] sm:$0x3] %vm253_vm0, %v198_v9  ;;  %1167 = vst.msk [vmem:[%s1268_s16 + $0x266] sm:$0x3] %vm253_vm0, %v198_v9 }
  0xa5   : > { %328 = vst.msk [vmem:[%s1268_s16 + $0x228] sm:$0x3] %vm253_vm0, %v199_v10  ;;  %912 = vst.msk [vmem:[%s1268_s16 + $0x22a] sm:$0x3] %vm253_vm0, %v199_v10 }
  0xa6   : > { %1040 = vst.msk [vmem:[%s1268_s16 + $0x268] sm:$0x3] %vm253_vm0, %v199_v10  ;;  %1168 = vst.msk [vmem:[%s1268_s16 + $0x26a] sm:$0x3] %vm253_vm0, %v199_v10 }
  0xa7   : > { %329 = vst.msk [vmem:[%s1268_s16 + $0x22c] sm:$0x3] %vm253_vm0, %v200_v11  ;;  %913 = vst.msk [vmem:[%s1268_s16 + $0x22e] sm:$0x3] %vm253_vm0, %v200_v11 }
  0xa8   : > { %1041 = vst.msk [vmem:[%s1268_s16 + $0x26c] sm:$0x3] %vm253_vm0, %v200_v11  ;;  %1169 = vst.msk [vmem:[%s1268_s16 + $0x26e] sm:$0x3] %vm253_vm0, %v200_v11 }
  0xa9   : > { %330 = vst.msk [vmem:[%s1268_s16 + $0x230] sm:$0x3] %vm253_vm0, %v201_v12  ;;  %914 = vst.msk [vmem:[%s1268_s16 + $0x232] sm:$0x3] %vm253_vm0, %v201_v12 }
  0xaa   : > { %1042 = vst.msk [vmem:[%s1268_s16 + $0x270] sm:$0x3] %vm253_vm0, %v201_v12  ;;  %1170 = vst.msk [vmem:[%s1268_s16 + $0x272] sm:$0x3] %vm253_vm0, %v201_v12 }
  0xab   : > { %331 = vst.msk [vmem:[%s1268_s16 + $0x234] sm:$0x3] %vm253_vm0, %v202_v13  ;;  %915 = vst.msk [vmem:[%s1268_s16 + $0x236] sm:$0x3] %vm253_vm0, %v202_v13 }
  0xac   : > { %1043 = vst.msk [vmem:[%s1268_s16 + $0x274] sm:$0x3] %vm253_vm0, %v202_v13  ;;  %1171 = vst.msk [vmem:[%s1268_s16 + $0x276] sm:$0x3] %vm253_vm0, %v202_v13 }
  0xad   : > { %332 = vst.msk [vmem:[%s1268_s16 + $0x238] sm:$0x3] %vm253_vm0, %v203_v14  ;;  %916 = vst.msk [vmem:[%s1268_s16 + $0x23a] sm:$0x3] %vm253_vm0, %v203_v14 }
  0xae   : > { %1044 = vst.msk [vmem:[%s1268_s16 + $0x278] sm:$0x3] %vm253_vm0, %v203_v14  ;;  %1172 = vst.msk [vmem:[%s1268_s16 + $0x27a] sm:$0x3] %vm253_vm0, %v203_v14 }
  0xaf   : > { %333 = vst.msk [vmem:[%s1268_s16 + $0x23c] sm:$0x3] %vm253_vm0, %v204_v15  ;;  %917 = vst.msk [vmem:[%s1268_s16 + $0x23e] sm:$0x3] %vm253_vm0, %v204_v15 }
  0xb0   : > { %1045 = vst.msk [vmem:[%s1268_s16 + $0x27c] sm:$0x3] %vm253_vm0, %v204_v15  ;;  %1173 = vst.msk [vmem:[%s1268_s16 + $0x27e] sm:$0x3] %vm253_vm0, %v204_v15 }
  0xb1   : > { %334 = vst.msk [vmem:[%s1268_s16 + $0x280] sm:$0x3] %vm253_vm0, %v205_v16  ;;  %918 = vst.msk [vmem:[%s1268_s16 + $0x282] sm:$0x3] %vm253_vm0, %v205_v16 }
  0xb2   : > { %1046 = vst.msk [vmem:[%s1268_s16 + $0x2c0] sm:$0x3] %vm253_vm0, %v205_v16  ;;  %1174 = vst.msk [vmem:[%s1268_s16 + $0x2c2] sm:$0x3] %vm253_vm0, %v205_v16 }
  0xb3   : > { %335 = vst.msk [vmem:[%s1268_s16 + $0x284] sm:$0x3] %vm253_vm0, %v206_v17  ;;  %919 = vst.msk [vmem:[%s1268_s16 + $0x286] sm:$0x3] %vm253_vm0, %v206_v17 }
  0xb4   : > { %1047 = vst.msk [vmem:[%s1268_s16 + $0x2c4] sm:$0x3] %vm253_vm0, %v206_v17  ;;  %1175 = vst.msk [vmem:[%s1268_s16 + $0x2c6] sm:$0x3] %vm253_vm0, %v206_v17 }
  0xb5   : > { %336 = vst.msk [vmem:[%s1268_s16 + $0x288] sm:$0x3] %vm253_vm0, %v207_v18  ;;  %920 = vst.msk [vmem:[%s1268_s16 + $0x28a] sm:$0x3] %vm253_vm0, %v207_v18 }
  0xb6   : > { %1048 = vst.msk [vmem:[%s1268_s16 + $0x2c8] sm:$0x3] %vm253_vm0, %v207_v18  ;;  %1176 = vst.msk [vmem:[%s1268_s16 + $0x2ca] sm:$0x3] %vm253_vm0, %v207_v18 }
  0xb7   : > { %337 = vst.msk [vmem:[%s1268_s16 + $0x28c] sm:$0x3] %vm253_vm0, %v208_v19  ;;  %921 = vst.msk [vmem:[%s1268_s16 + $0x28e] sm:$0x3] %vm253_vm0, %v208_v19 }
  0xb8   : > { %1049 = vst.msk [vmem:[%s1268_s16 + $0x2cc] sm:$0x3] %vm253_vm0, %v208_v19  ;;  %1177 = vst.msk [vmem:[%s1268_s16 + $0x2ce] sm:$0x3] %vm253_vm0, %v208_v19 }
  0xb9   : > { %338 = vst.msk [vmem:[%s1268_s16 + $0x290] sm:$0x3] %vm253_vm0, %v209_v20  ;;  %922 = vst.msk [vmem:[%s1268_s16 + $0x292] sm:$0x3] %vm253_vm0, %v209_v20 }
  0xba   : > { %1050 = vst.msk [vmem:[%s1268_s16 + $0x2d0] sm:$0x3] %vm253_vm0, %v209_v20  ;;  %1178 = vst.msk [vmem:[%s1268_s16 + $0x2d2] sm:$0x3] %vm253_vm0, %v209_v20 }
  0xbb   : > { %339 = vst.msk [vmem:[%s1268_s16 + $0x294] sm:$0x3] %vm253_vm0, %v210_v21  ;;  %923 = vst.msk [vmem:[%s1268_s16 + $0x296] sm:$0x3] %vm253_vm0, %v210_v21 }
  0xbc   : > { %1051 = vst.msk [vmem:[%s1268_s16 + $0x2d4] sm:$0x3] %vm253_vm0, %v210_v21  ;;  %1179 = vst.msk [vmem:[%s1268_s16 + $0x2d6] sm:$0x3] %vm253_vm0, %v210_v21 }
  0xbd   : > { %340 = vst.msk [vmem:[%s1268_s16 + $0x298] sm:$0x3] %vm253_vm0, %v211_v22  ;;  %924 = vst.msk [vmem:[%s1268_s16 + $0x29a] sm:$0x3] %vm253_vm0, %v211_v22 }
  0xbe   : > { %1052 = vst.msk [vmem:[%s1268_s16 + $0x2d8] sm:$0x3] %vm253_vm0, %v211_v22  ;;  %1180 = vst.msk [vmem:[%s1268_s16 + $0x2da] sm:$0x3] %vm253_vm0, %v211_v22 }
  0xbf   : > { %341 = vst.msk [vmem:[%s1268_s16 + $0x29c] sm:$0x3] %vm253_vm0, %v212_v23  ;;  %925 = vst.msk [vmem:[%s1268_s16 + $0x29e] sm:$0x3] %vm253_vm0, %v212_v23 }
  0xc0   : > { %1053 = vst.msk [vmem:[%s1268_s16 + $0x2dc] sm:$0x3] %vm253_vm0, %v212_v23  ;;  %1181 = vst.msk [vmem:[%s1268_s16 + $0x2de] sm:$0x3] %vm253_vm0, %v212_v23 }
  0xc1   : > { %342 = vst.msk [vmem:[%s1268_s16 + $0x2a0] sm:$0x3] %vm253_vm0, %v213_v24  ;;  %926 = vst.msk [vmem:[%s1268_s16 + $0x2a2] sm:$0x3] %vm253_vm0, %v213_v24 }
  0xc2   : > { %1054 = vst.msk [vmem:[%s1268_s16 + $0x2e0] sm:$0x3] %vm253_vm0, %v213_v24  ;;  %1182 = vst.msk [vmem:[%s1268_s16 + $0x2e2] sm:$0x3] %vm253_vm0, %v213_v24 }
  0xc3   : > { %343 = vst.msk [vmem:[%s1268_s16 + $0x2a4] sm:$0x3] %vm253_vm0, %v214_v25  ;;  %927 = vst.msk [vmem:[%s1268_s16 + $0x2a6] sm:$0x3] %vm253_vm0, %v214_v25 }
  0xc4   : > { %1055 = vst.msk [vmem:[%s1268_s16 + $0x2e4] sm:$0x3] %vm253_vm0, %v214_v25  ;;  %1183 = vst.msk [vmem:[%s1268_s16 + $0x2e6] sm:$0x3] %vm253_vm0, %v214_v25 }
  0xc5   : > { %344 = vst.msk [vmem:[%s1268_s16 + $0x2a8] sm:$0x3] %vm253_vm0, %v215_v26  ;;  %928 = vst.msk [vmem:[%s1268_s16 + $0x2aa] sm:$0x3] %vm253_vm0, %v215_v26 }
  0xc6   : > { %1056 = vst.msk [vmem:[%s1268_s16 + $0x2e8] sm:$0x3] %vm253_vm0, %v215_v26  ;;  %1184 = vst.msk [vmem:[%s1268_s16 + $0x2ea] sm:$0x3] %vm253_vm0, %v215_v26 }
  0xc7   : > { %345 = vst.msk [vmem:[%s1268_s16 + $0x2ac] sm:$0x3] %vm253_vm0, %v216_v27  ;;  %929 = vst.msk [vmem:[%s1268_s16 + $0x2ae] sm:$0x3] %vm253_vm0, %v216_v27 }
  0xc8   : > { %1057 = vst.msk [vmem:[%s1268_s16 + $0x2ec] sm:$0x3] %vm253_vm0, %v216_v27  ;;  %1185 = vst.msk [vmem:[%s1268_s16 + $0x2ee] sm:$0x3] %vm253_vm0, %v216_v27 }
  0xc9   : > { %346 = vst.msk [vmem:[%s1268_s16 + $0x2b0] sm:$0x3] %vm253_vm0, %v217_v28  ;;  %930 = vst.msk [vmem:[%s1268_s16 + $0x2b2] sm:$0x3] %vm253_vm0, %v217_v28 }
  0xca   : > { %1058 = vst.msk [vmem:[%s1268_s16 + $0x2f0] sm:$0x3] %vm253_vm0, %v217_v28  ;;  %1186 = vst.msk [vmem:[%s1268_s16 + $0x2f2] sm:$0x3] %vm253_vm0, %v217_v28 }
  0xcb   : > { %347 = vst.msk [vmem:[%s1268_s16 + $0x2b4] sm:$0x3] %vm253_vm0, %v218_v29  ;;  %931 = vst.msk [vmem:[%s1268_s16 + $0x2b6] sm:$0x3] %vm253_vm0, %v218_v29 }
  0xcc   : > { %1059 = vst.msk [vmem:[%s1268_s16 + $0x2f4] sm:$0x3] %vm253_vm0, %v218_v29  ;;  %1187 = vst.msk [vmem:[%s1268_s16 + $0x2f6] sm:$0x3] %vm253_vm0, %v218_v29 }
  0xcd   : > { %348 = vst.msk [vmem:[%s1268_s16 + $0x2b8] sm:$0x3] %vm253_vm0, %v219_v30  ;;  %932 = vst.msk [vmem:[%s1268_s16 + $0x2ba] sm:$0x3] %vm253_vm0, %v219_v30 }
  0xce   : > { %1060 = vst.msk [vmem:[%s1268_s16 + $0x2f8] sm:$0x3] %vm253_vm0, %v219_v30  ;;  %1188 = vst.msk [vmem:[%s1268_s16 + $0x2fa] sm:$0x3] %vm253_vm0, %v219_v30 }
  0xcf   : > { %349 = vst.msk [vmem:[%s1268_s16 + $0x2bc] sm:$0x3] %vm253_vm0, %v220_v31  ;;  %933 = vst.msk [vmem:[%s1268_s16 + $0x2be] sm:$0x3] %vm253_vm0, %v220_v31 }
  0xd0   : > { %1061 = vst.msk [vmem:[%s1268_s16 + $0x2fc] sm:$0x3] %vm253_vm0, %v220_v31  ;;  %1189 = vst.msk [vmem:[%s1268_s16 + $0x2fe] sm:$0x3] %vm253_vm0, %v220_v31 }
  0xd1   : > { %350 = vst.msk [vmem:[%s1268_s16 + $0x300] sm:$0x3] %vm253_vm0, %v221_v32  ;;  %934 = vst.msk [vmem:[%s1268_s16 + $0x302] sm:$0x3] %vm253_vm0, %v221_v32 }
  0xd2   : > { %1062 = vst.msk [vmem:[%s1268_s16 + $0x340] sm:$0x3] %vm253_vm0, %v221_v32  ;;  %1190 = vst.msk [vmem:[%s1268_s16 + $0x342] sm:$0x3] %vm253_vm0, %v221_v32 }
  0xd3   : > { %351 = vst.msk [vmem:[%s1268_s16 + $0x304] sm:$0x3] %vm253_vm0, %v222_v33  ;;  %935 = vst.msk [vmem:[%s1268_s16 + $0x306] sm:$0x3] %vm253_vm0, %v222_v33 }
  0xd4   : > { %1063 = vst.msk [vmem:[%s1268_s16 + $0x344] sm:$0x3] %vm253_vm0, %v222_v33  ;;  %1191 = vst.msk [vmem:[%s1268_s16 + $0x346] sm:$0x3] %vm253_vm0, %v222_v33 }
  0xd5   : > { %352 = vst.msk [vmem:[%s1268_s16 + $0x308] sm:$0x3] %vm253_vm0, %v223_v34  ;;  %936 = vst.msk [vmem:[%s1268_s16 + $0x30a] sm:$0x3] %vm253_vm0, %v223_v34 }
  0xd6   : > { %1064 = vst.msk [vmem:[%s1268_s16 + $0x348] sm:$0x3] %vm253_vm0, %v223_v34  ;;  %1192 = vst.msk [vmem:[%s1268_s16 + $0x34a] sm:$0x3] %vm253_vm0, %v223_v34 }
  0xd7   : > { %353 = vst.msk [vmem:[%s1268_s16 + $0x30c] sm:$0x3] %vm253_vm0, %v224_v35  ;;  %937 = vst.msk [vmem:[%s1268_s16 + $0x30e] sm:$0x3] %vm253_vm0, %v224_v35 }
  0xd8   : > { %1065 = vst.msk [vmem:[%s1268_s16 + $0x34c] sm:$0x3] %vm253_vm0, %v224_v35  ;;  %1193 = vst.msk [vmem:[%s1268_s16 + $0x34e] sm:$0x3] %vm253_vm0, %v224_v35 }
  0xd9   : > { %354 = vst.msk [vmem:[%s1268_s16 + $0x310] sm:$0x3] %vm253_vm0, %v225_v36  ;;  %938 = vst.msk [vmem:[%s1268_s16 + $0x312] sm:$0x3] %vm253_vm0, %v225_v36 }
  0xda   : > { %1066 = vst.msk [vmem:[%s1268_s16 + $0x350] sm:$0x3] %vm253_vm0, %v225_v36  ;;  %1194 = vst.msk [vmem:[%s1268_s16 + $0x352] sm:$0x3] %vm253_vm0, %v225_v36 }
  0xdb   : > { %355 = vst.msk [vmem:[%s1268_s16 + $0x314] sm:$0x3] %vm253_vm0, %v226_v37  ;;  %939 = vst.msk [vmem:[%s1268_s16 + $0x316] sm:$0x3] %vm253_vm0, %v226_v37 }
  0xdc   : > { %1067 = vst.msk [vmem:[%s1268_s16 + $0x354] sm:$0x3] %vm253_vm0, %v226_v37  ;;  %1195 = vst.msk [vmem:[%s1268_s16 + $0x356] sm:$0x3] %vm253_vm0, %v226_v37 }
  0xdd   : > { %356 = vst.msk [vmem:[%s1268_s16 + $0x318] sm:$0x3] %vm253_vm0, %v227_v38  ;;  %940 = vst.msk [vmem:[%s1268_s16 + $0x31a] sm:$0x3] %vm253_vm0, %v227_v38 }
  0xde   : > { %1068 = vst.msk [vmem:[%s1268_s16 + $0x358] sm:$0x3] %vm253_vm0, %v227_v38  ;;  %1196 = vst.msk [vmem:[%s1268_s16 + $0x35a] sm:$0x3] %vm253_vm0, %v227_v38 }
  0xdf   : > { %357 = vst.msk [vmem:[%s1268_s16 + $0x31c] sm:$0x3] %vm253_vm0, %v228_v39  ;;  %941 = vst.msk [vmem:[%s1268_s16 + $0x31e] sm:$0x3] %vm253_vm0, %v228_v39 }
  0xe0   : > { %1069 = vst.msk [vmem:[%s1268_s16 + $0x35c] sm:$0x3] %vm253_vm0, %v228_v39  ;;  %1197 = vst.msk [vmem:[%s1268_s16 + $0x35e] sm:$0x3] %vm253_vm0, %v228_v39 }
  0xe1   : > { %358 = vst.msk [vmem:[%s1268_s16 + $0x320] sm:$0x3] %vm253_vm0, %v229_v40  ;;  %942 = vst.msk [vmem:[%s1268_s16 + $0x322] sm:$0x3] %vm253_vm0, %v229_v40 }
  0xe2   : > { %1070 = vst.msk [vmem:[%s1268_s16 + $0x360] sm:$0x3] %vm253_vm0, %v229_v40  ;;  %1198 = vst.msk [vmem:[%s1268_s16 + $0x362] sm:$0x3] %vm253_vm0, %v229_v40 }
  0xe3   : > { %359 = vst.msk [vmem:[%s1268_s16 + $0x324] sm:$0x3] %vm253_vm0, %v230_v41  ;;  %943 = vst.msk [vmem:[%s1268_s16 + $0x326] sm:$0x3] %vm253_vm0, %v230_v41 }
  0xe4   : > { %1071 = vst.msk [vmem:[%s1268_s16 + $0x364] sm:$0x3] %vm253_vm0, %v230_v41  ;;  %1199 = vst.msk [vmem:[%s1268_s16 + $0x366] sm:$0x3] %vm253_vm0, %v230_v41 }
  0xe5   : > { %360 = vst.msk [vmem:[%s1268_s16 + $0x328] sm:$0x3] %vm253_vm0, %v231_v42  ;;  %944 = vst.msk [vmem:[%s1268_s16 + $0x32a] sm:$0x3] %vm253_vm0, %v231_v42 }
  0xe6   : > { %1072 = vst.msk [vmem:[%s1268_s16 + $0x368] sm:$0x3] %vm253_vm0, %v231_v42  ;;  %1200 = vst.msk [vmem:[%s1268_s16 + $0x36a] sm:$0x3] %vm253_vm0, %v231_v42 }
  0xe7   : > { %361 = vst.msk [vmem:[%s1268_s16 + $0x32c] sm:$0x3] %vm253_vm0, %v232_v43  ;;  %945 = vst.msk [vmem:[%s1268_s16 + $0x32e] sm:$0x3] %vm253_vm0, %v232_v43 }
  0xe8   : > { %1073 = vst.msk [vmem:[%s1268_s16 + $0x36c] sm:$0x3] %vm253_vm0, %v232_v43  ;;  %1201 = vst.msk [vmem:[%s1268_s16 + $0x36e] sm:$0x3] %vm253_vm0, %v232_v43 }
  0xe9   : > { %362 = vst.msk [vmem:[%s1268_s16 + $0x330] sm:$0x3] %vm253_vm0, %v233_v44  ;;  %946 = vst.msk [vmem:[%s1268_s16 + $0x332] sm:$0x3] %vm253_vm0, %v233_v44 }
  0xea   : > { %1074 = vst.msk [vmem:[%s1268_s16 + $0x370] sm:$0x3] %vm253_vm0, %v233_v44  ;;  %1202 = vst.msk [vmem:[%s1268_s16 + $0x372] sm:$0x3] %vm253_vm0, %v233_v44 }
  0xeb   : > { %363 = vst.msk [vmem:[%s1268_s16 + $0x334] sm:$0x3] %vm253_vm0, %v234_v45  ;;  %947 = vst.msk [vmem:[%s1268_s16 + $0x336] sm:$0x3] %vm253_vm0, %v234_v45 }
  0xec   : > { %1075 = vst.msk [vmem:[%s1268_s16 + $0x374] sm:$0x3] %vm253_vm0, %v234_v45  ;;  %1203 = vst.msk [vmem:[%s1268_s16 + $0x376] sm:$0x3] %vm253_vm0, %v234_v45 }
  0xed   : > { %364 = vst.msk [vmem:[%s1268_s16 + $0x338] sm:$0x3] %vm253_vm0, %v235_v46  ;;  %948 = vst.msk [vmem:[%s1268_s16 + $0x33a] sm:$0x3] %vm253_vm0, %v235_v46 }
  0xee   : > { %1076 = vst.msk [vmem:[%s1268_s16 + $0x378] sm:$0x3] %vm253_vm0, %v235_v46  ;;  %1204 = vst.msk [vmem:[%s1268_s16 + $0x37a] sm:$0x3] %vm253_vm0, %v235_v46 }
  0xef   : > { %365 = vst.msk [vmem:[%s1268_s16 + $0x33c] sm:$0x3] %vm253_vm0, %v236_v47  ;;  %949 = vst.msk [vmem:[%s1268_s16 + $0x33e] sm:$0x3] %vm253_vm0, %v236_v47 }
  0xf0   : > { %1077 = vst.msk [vmem:[%s1268_s16 + $0x37c] sm:$0x3] %vm253_vm0, %v236_v47  ;;  %1205 = vst.msk [vmem:[%s1268_s16 + $0x37e] sm:$0x3] %vm253_vm0, %v236_v47 }
  0xf1   : > { %366 = vst.msk [vmem:[%s1268_s16 + $0x380] sm:$0x3] %vm253_vm0, %v237_v48  ;;  %950 = vst.msk [vmem:[%s1268_s16 + $0x382] sm:$0x3] %vm253_vm0, %v237_v48 }
  0xf2   : > { %1078 = vst.msk [vmem:[%s1268_s16 + $0x3c0] sm:$0x3] %vm253_vm0, %v237_v48  ;;  %1206 = vst.msk [vmem:[%s1268_s16 + $0x3c2] sm:$0x3] %vm253_vm0, %v237_v48 }
  0xf3   : > { %367 = vst.msk [vmem:[%s1268_s16 + $0x384] sm:$0x3] %vm253_vm0, %v238_v49  ;;  %951 = vst.msk [vmem:[%s1268_s16 + $0x386] sm:$0x3] %vm253_vm0, %v238_v49 }
  0xf4   : > { %1079 = vst.msk [vmem:[%s1268_s16 + $0x3c4] sm:$0x3] %vm253_vm0, %v238_v49  ;;  %1207 = vst.msk [vmem:[%s1268_s16 + $0x3c6] sm:$0x3] %vm253_vm0, %v238_v49 }
  0xf5   : > { %368 = vst.msk [vmem:[%s1268_s16 + $0x388] sm:$0x3] %vm253_vm0, %v239_v50  ;;  %952 = vst.msk [vmem:[%s1268_s16 + $0x38a] sm:$0x3] %vm253_vm0, %v239_v50 }
  0xf6   : > { %1080 = vst.msk [vmem:[%s1268_s16 + $0x3c8] sm:$0x3] %vm253_vm0, %v239_v50  ;;  %1208 = vst.msk [vmem:[%s1268_s16 + $0x3ca] sm:$0x3] %vm253_vm0, %v239_v50 }
  0xf7   : > { %369 = vst.msk [vmem:[%s1268_s16 + $0x38c] sm:$0x3] %vm253_vm0, %v240_v51  ;;  %953 = vst.msk [vmem:[%s1268_s16 + $0x38e] sm:$0x3] %vm253_vm0, %v240_v51 }
  0xf8   : > { %1081 = vst.msk [vmem:[%s1268_s16 + $0x3cc] sm:$0x3] %vm253_vm0, %v240_v51  ;;  %1209 = vst.msk [vmem:[%s1268_s16 + $0x3ce] sm:$0x3] %vm253_vm0, %v240_v51 }
  0xf9   : > { %370 = vst.msk [vmem:[%s1268_s16 + $0x390] sm:$0x3] %vm253_vm0, %v241_v52  ;;  %954 = vst.msk [vmem:[%s1268_s16 + $0x392] sm:$0x3] %vm253_vm0, %v241_v52 }
  0xfa   : > { %1082 = vst.msk [vmem:[%s1268_s16 + $0x3d0] sm:$0x3] %vm253_vm0, %v241_v52  ;;  %1210 = vst.msk [vmem:[%s1268_s16 + $0x3d2] sm:$0x3] %vm253_vm0, %v241_v52 }
  0xfb   : > { %371 = vst.msk [vmem:[%s1268_s16 + $0x394] sm:$0x3] %vm253_vm0, %v242_v53  ;;  %955 = vst.msk [vmem:[%s1268_s16 + $0x396] sm:$0x3] %vm253_vm0, %v242_v53 }
  0xfc   : > { %1083 = vst.msk [vmem:[%s1268_s16 + $0x3d4] sm:$0x3] %vm253_vm0, %v242_v53  ;;  %1211 = vst.msk [vmem:[%s1268_s16 + $0x3d6] sm:$0x3] %vm253_vm0, %v242_v53 }
  0xfd   : > { %372 = vst.msk [vmem:[%s1268_s16 + $0x398] sm:$0x3] %vm253_vm0, %v243_v54  ;;  %956 = vst.msk [vmem:[%s1268_s16 + $0x39a] sm:$0x3] %vm253_vm0, %v243_v54 }
  0xfe   : > { %1084 = vst.msk [vmem:[%s1268_s16 + $0x3d8] sm:$0x3] %vm253_vm0, %v243_v54  ;;  %1212 = vst.msk [vmem:[%s1268_s16 + $0x3da] sm:$0x3] %vm253_vm0, %v243_v54 }
  0xff   : > { %373 = vst.msk [vmem:[%s1268_s16 + $0x39c] sm:$0x3] %vm253_vm0, %v244_v55  ;;  %957 = vst.msk [vmem:[%s1268_s16 + $0x39e] sm:$0x3] %vm253_vm0, %v244_v55 }
 0x100   : > { %1085 = vst.msk [vmem:[%s1268_s16 + $0x3dc] sm:$0x3] %vm253_vm0, %v244_v55  ;;  %1213 = vst.msk [vmem:[%s1268_s16 + $0x3de] sm:$0x3] %vm253_vm0, %v244_v55 }
 0x101   : > { %374 = vst.msk [vmem:[%s1268_s16 + $0x3a0] sm:$0x3] %vm253_vm0, %v245_v56  ;;  %958 = vst.msk [vmem:[%s1268_s16 + $0x3a2] sm:$0x3] %vm253_vm0, %v245_v56 }
 0x102   : > { %1086 = vst.msk [vmem:[%s1268_s16 + $0x3e0] sm:$0x3] %vm253_vm0, %v245_v56  ;;  %1214 = vst.msk [vmem:[%s1268_s16 + $0x3e2] sm:$0x3] %vm253_vm0, %v245_v56 }
 0x103   : > { %375 = vst.msk [vmem:[%s1268_s16 + $0x3a4] sm:$0x3] %vm253_vm0, %v246_v57  ;;  %959 = vst.msk [vmem:[%s1268_s16 + $0x3a6] sm:$0x3] %vm253_vm0, %v246_v57 }
 0x104   : > { %1087 = vst.msk [vmem:[%s1268_s16 + $0x3e4] sm:$0x3] %vm253_vm0, %v246_v57  ;;  %1215 = vst.msk [vmem:[%s1268_s16 + $0x3e6] sm:$0x3] %vm253_vm0, %v246_v57 }
 0x105   : > { %376 = vst.msk [vmem:[%s1268_s16 + $0x3a8] sm:$0x3] %vm253_vm0, %v247_v58  ;;  %960 = vst.msk [vmem:[%s1268_s16 + $0x3aa] sm:$0x3] %vm253_vm0, %v247_v58 }
 0x106   : > { %1088 = vst.msk [vmem:[%s1268_s16 + $0x3e8] sm:$0x3] %vm253_vm0, %v247_v58  ;;  %1216 = vst.msk [vmem:[%s1268_s16 + $0x3ea] sm:$0x3] %vm253_vm0, %v247_v58 }
 0x107   : > { %377 = vst.msk [vmem:[%s1268_s16 + $0x3ac] sm:$0x3] %vm253_vm0, %v248_v59  ;;  %961 = vst.msk [vmem:[%s1268_s16 + $0x3ae] sm:$0x3] %vm253_vm0, %v248_v59 }
 0x108   : > { %1089 = vst.msk [vmem:[%s1268_s16 + $0x3ec] sm:$0x3] %vm253_vm0, %v248_v59  ;;  %1217 = vst.msk [vmem:[%s1268_s16 + $0x3ee] sm:$0x3] %vm253_vm0, %v248_v59 }
 0x109   : > { %378 = vst.msk [vmem:[%s1268_s16 + $0x3b0] sm:$0x3] %vm253_vm0, %v249_v60  ;;  %962 = vst.msk [vmem:[%s1268_s16 + $0x3b2] sm:$0x3] %vm253_vm0, %v249_v60 }
 0x10a   : > { %1090 = vst.msk [vmem:[%s1268_s16 + $0x3f0] sm:$0x3] %vm253_vm0, %v249_v60  ;;  %1218 = vst.msk [vmem:[%s1268_s16 + $0x3f2] sm:$0x3] %vm253_vm0, %v249_v60 }
 0x10b   : > { %379 = vst.msk [vmem:[%s1268_s16 + $0x3b4] sm:$0x3] %vm253_vm0, %v250_v61  ;;  %963 = vst.msk [vmem:[%s1268_s16 + $0x3b6] sm:$0x3] %vm253_vm0, %v250_v61 }
 0x10c   : > { %1091 = vst.msk [vmem:[%s1268_s16 + $0x3f4] sm:$0x3] %vm253_vm0, %v250_v61  ;;  %1219 = vst.msk [vmem:[%s1268_s16 + $0x3f6] sm:$0x3] %vm253_vm0, %v250_v61 }
 0x10d   : > { %380 = vst.msk [vmem:[%s1268_s16 + $0x3b8] sm:$0x3] %vm253_vm0, %v251_v62  ;;  %964 = vst.msk [vmem:[%s1268_s16 + $0x3ba] sm:$0x3] %vm253_vm0, %v251_v62 }
 0x10e   : > { %1092 = vst.msk [vmem:[%s1268_s16 + $0x3f8] sm:$0x3] %vm253_vm0, %v251_v62  ;;  %1220 = vst.msk [vmem:[%s1268_s16 + $0x3fa] sm:$0x3] %vm253_vm0, %v251_v62 }
 0x10f   : > { %381 = vst.msk [vmem:[%s1268_s16 + $0x3bc] sm:$0x3] %vm253_vm0, %v252_v63  ;;  %965 = vst.msk [vmem:[%s1268_s16 + $0x3be] sm:$0x3] %vm253_vm0, %v252_v63 }
 0x110   : > { %1093 = vst.msk [vmem:[%s1268_s16 + $0x3fc] sm:$0x3] %vm253_vm0, %v252_v63  ;;  %1221 = vst.msk [vmem:[%s1268_s16 + $0x3fe] sm:$0x3] %vm253_vm0, %v252_v63 }
 0x111 PF: > { %s11_s6 = sadd.s32 1, %s1240_s6  }
 0x112   : > { %p8_p4 = scmp.ge.s32.totalorder %s11_s6, 4  }
 0x114   :  { %10 = sbr.rel (!%p8_p4) target bundleno = 1 (0x1), region = 57 }

</bundles_post_ra>
